<compile_context>
chip_gen: v6e
topology: v6e:2x2x1
jax: 0.10.0
libtpu: 0.0.40
codegen_flags: <defaults>
</compile_context>

<pallas_src>
import jax
import jax.numpy as jnp
from jax.experimental import pallas as pl
from jax.experimental.pallas import tpu as pltpu


def _round_up(v, m):
    return ((v + m - 1) // m) * m


def _patch_embed_kernel(x_ref, w_ref, pos_ref, o_ref):
    # x_ref:   (tm, Kp)       bf16  -- tm = nb*N flattened patch rows (K zero-padded)
    # w_ref:   (Kp, Ep)       bf16  -- conv weight, rows ordered (c, kh, kw)
    # pos_ref: (N+1, Ep)      f32   -- rows :N = pos_embed+bias, row N = pos_embed+cls
    # o_ref:   (nb, N+1, Ep)  out   -- one full (N+1, E) sequence per image
    nb, n_plus_1, ep = o_ref.shape
    n = n_plus_1 - 1

    proj = jnp.dot(x_ref[...], w_ref[...],
                   preferred_element_type=jnp.float32)            # (nb*N, Ep) f32 accum
    pos = pos_ref[...]                                            # (N+1, Ep) f32

    # Patch rows: proj + (pos[:N] + bias), broadcast over the nb images.
    o_ref[:, :n, :] = (proj.reshape(nb, n, ep)
                       + pos[:n, :][None, :, :]).astype(o_ref.dtype)
    # cls row appended at the END (dim=1), already fused with pos_embed[N].
    cls_rows = jnp.broadcast_to(pos[n:, :].reshape(1, 1, ep), (nb, 1, ep))
    o_ref[:, n:, :] = cls_rows.astype(o_ref.dtype)


def _pick_images_per_tile(batch, n_patches, target_rows=512):
    """Images per grid step (nb).  Constraints, in priority order:
      * nb divides batch.
      * grid length batch//nb >= 2 when batch >= 2 (v7x has 2 TensorCores).
      * tm = nb*n_patches is a multiple of 16 (bf16 sublane packing); fall
        back to 8, then to nb=batch (full-M block is always a legal tile).
      * smallest nb with tm >= target_rows (amortize ~0.35us/step overhead);
        otherwise the largest admissible nb.
    """
    divisors = [d for d in range(1, batch + 1) if batch % d == 0]
    cap = batch // 2 if batch >= 2 else batch
    for align in (16, 8):
        cands = [d for d in divisors if d <= cap and (d * n_patches) % align == 0]
        if not cands:
            continue
        for nb in cands:
            if nb * n_patches >= target_rows:
                return nb
        return cands[-1]
    return batch  # single step, full-M block (megacore sharding lost; rare shapes only)


def patch_embeded_forward(x_nchw, conv_w, conv_b, cls_token, pos_embed,
                          patch_size, *, compute_dtype=jnp.bfloat16,
                          out_dtype=jnp.bfloat16):
    """x_nchw: (B, C, H, W). Returns (B, N+1, E), matching the PyTorch module."""
    B, C, H, W = x_nchw.shape
    p = patch_size
    Hp, Wp = H // p, W // p
    N = Hp * Wp
    E = conv_w.shape[0]
    K = C * p * p

    Ep = _round_up(E, 128)   # lane-dense output stores
    Kp = _round_up(K, 128)   # lane-dense x loads / full-width MXU contraction

    # ---- host-side (XLA) preprocessing -------------------------------------
    # Patch extraction with (c, kh, kw) inner ordering matching Conv2d weight
    # flattening.  cast + reshape + transpose + pad fuse into ONE XLA copy.
    patches = (x_nchw.astype(compute_dtype)
               .reshape(B, C, Hp, p, Wp, p)
               .transpose(0, 2, 4, 1, 3, 5)
               .reshape(B * N, K))
    patches = jnp.pad(patches, ((0, 0), (0, Kp - K)))              # (B*N, Kp) bf16

    w_mat = conv_w.reshape(E, K).T.astype(compute_dtype)
    w_mat = jnp.pad(w_mat, ((0, Kp - K), (0, Ep - E)))             # (Kp, Ep) bf16

    # Fold conv bias into the patch rows of pos_embed and cls_token into the
    # final row — the kernel then only does one broadcast add + one row copy.
    pos_patch = (pos_embed[0, :N, :].astype(jnp.float32)
                 + conv_b.astype(jnp.float32)[None, :])            # (N, E)
    cls_row = (cls_token[0, 0, :] + pos_embed[0, N, :]).astype(jnp.float32)
    pos_full = jnp.concatenate([pos_patch, cls_row[None, :]], axis=0)
    pos_full = jnp.pad(pos_full, ((0, 0), (0, Ep - E)))            # (N+1, Ep) f32

    nb = _pick_images_per_tile(B, N)
    tm = nb * N

    out = pl.pallas_call(
        _patch_embed_kernel,
        out_shape=jax.ShapeDtypeStruct((B, N + 1, Ep), out_dtype),
        grid_spec=pltpu.PrefetchScalarGridSpec(
            num_scalar_prefetch=0,
            grid=(B // nb,),
            in_specs=[
                pl.BlockSpec((tm, Kp), lambda i: (i, 0)),       # per-step patch rows
                pl.BlockSpec((Kp, Ep), lambda i: (0, 0)),       # resident weight
                pl.BlockSpec((N + 1, Ep), lambda i: (0, 0)),    # resident pos(+bias,+cls)
            ],
            out_specs=pl.BlockSpec((nb, N + 1, Ep), lambda i: (i, 0, 0)),
        ),
        compiler_params=pltpu.CompilerParams(
            dimension_semantics=("parallel",),
            vmem_limit_bytes=64 * 1024 * 1024,
        ),
    )(patches, w_mat, pos_full)

    if Ep != E:
        out = out[:, :, :E]   # single fused un-pad slice (no-op for E % 128 == 0)
    return out


# ---------------------------------------------------------------------------
# References for validation.
# ---------------------------------------------------------------------------
def reference_forward_f32(x_nchw, conv_w, conv_b, cls_token, pos_embed, patch_size):
    """Pure-JAX f32 reference mirroring the PyTorch forward (conv path)."""
    B = x_nchw.shape[0]
    E = conv_w.shape[0]
    y = jax.lax.conv_general_dilated(
        x_nchw, conv_w,
        window_strides=(patch_size, patch_size),
        padding="VALID",
        dimension_numbers=("NCHW", "OIHW", "NCHW"),
    ) + conv_b.reshape(1, E, 1, 1)                        # (B, E, Hp, Wp)
    y = y.reshape(B, E, -1).transpose(0, 2, 1)            # (B, N, E)
    cls = jnp.broadcast_to(cls_token, (B, 1, E))
    y = jnp.concatenate([y, cls], axis=1)                 # (B, N+1, E)
    return y + pos_embed


def reference_forward_bf16(x_nchw, conv_w, conv_b, cls_token, pos_embed, patch_size,
                           out_dtype=jnp.bfloat16):
    """Reference using the same bf16-input / f32-accum matmul path as the kernel."""
    B, C, H, W = x_nchw.shape
    p = patch_size
    Hp, Wp = H // p, W // p
    N = Hp * Wp
    E = conv_w.shape[0]
    K = C * p * p
    patches = (x_nchw.astype(jnp.bfloat16)
               .reshape(B, C, Hp, p, Wp, p)
               .transpose(0, 2, 4, 1, 3, 5).reshape(B, N, K))
    w = conv_w.reshape(E, K).T.astype(jnp.bfloat16)
    proj = jnp.einsum("bnk,ke->bne", patches, w,
                      preferred_element_type=jnp.float32) + conv_b[None, None, :]
    cls = jnp.broadcast_to(cls_token, (B, 1, E))
    y = jnp.concatenate([proj, cls], axis=1) + pos_embed
    return y.astype(out_dtype)


if __name__ == "__main__":
    # Small shapes consistent with the module: image 16x16, patch 4,
    # in_channel 4, embed_dim 32 -> num_patches = 16, seq = 17.
    B, C, H, W = 2, 4, 16, 16
    patch_size = 4
    embed_dim = 32
    num_patches = (H // patch_size) * (W // patch_size)

    key = jax.random.PRNGKey(0)
    kx, kw, kb, kc, kp = jax.random.split(key, 5)

    x = jax.random.normal(kx, (B, C, H, W), dtype=jnp.float32)
    conv_w = jax.random.normal(
        kw, (embed_dim, C, patch_size, patch_size), dtype=jnp.float32) * 0.05
    conv_b = jax.random.normal(kb, (embed_dim,), dtype=jnp.float32) * 0.05
    # Module inits these to zeros; random deterministic values exercise the
    # add / cls-row path non-trivially.
    cls_token = jax.random.normal(kc, (1, 1, embed_dim), dtype=jnp.float32) * 0.02
    pos_embed = jax.random.normal(
        kp, (1, num_patches + 1, embed_dim), dtype=jnp.float32) * 0.02

    out = patch_embeded_forward(x, conv_w, conv_b, cls_token, pos_embed, patch_size)
    out = jax.block_until_ready(out)
    assert out.shape == (B, num_patches + 1, embed_dim), out.shape
    assert out.dtype == jnp.bfloat16, out.dtype
    out_f32 = out.astype(jnp.float32)

    # Check against a reference using the same bf16/f32-accum math (tolerance
    # covers one bf16 ulp of output rounding).
    ref_bf16 = jax.block_until_ready(
        reference_forward_bf16(x, conv_w, conv_b, cls_token, pos_embed, patch_size)
    ).astype(jnp.float32)
    if not jnp.allclose(out_f32, ref_bf16, atol=2e-2, rtol=2e-2):
        raise AssertionError("Pallas kernel output mismatch vs bf16-path reference")

    # Loose semantic check against the full-f32 conv reference (bf16 inputs /
    # bf16 output introduce ~1e-2 absolute error at these magnitudes).
    ref_f32 = jax.block_until_ready(
        reference_forward_f32(x, conv_w, conv_b, cls_token, pos_embed, patch_size))
    if not jnp.allclose(out_f32, ref_f32, atol=6e-2, rtol=6e-2):
        raise AssertionError("Pallas kernel output mismatch vs f32 conv reference")

    print("KERNEL_OK")
</pallas_src>

<mosaic_0001>
module attributes {stable_mosaic.version = 11 : i64} {
  func.func @_patch_embed_kernel(%arg0: i32, %arg1: memref<16x128xbf16, #tpu.memory_space<vmem>>, %arg2: memref<128x128xbf16, #tpu.memory_space<vmem>>, %arg3: memref<17x128xf32, #tpu.memory_space<vmem>>, %arg4: memref<1x17x128xbf16, #tpu.memory_space<vmem>>) attributes {dimension_semantics = [#tpu.dimension_semantics<parallel>], iteration_bounds = array<i64: 2>, scalar_prefetch = 0 : i64, scratch_operands = 0 : i64, tpu.core_type = #tpu.core_type<tc>, window_params = [{transform_indices = @transform_0, window_bounds = array<i64: 16, 128>}, {pipeline_mode = #tpu.pipeline_mode<synchronous>, transform_indices = @transform_1, window_bounds = array<i64: 128, 128>}, {pipeline_mode = #tpu.pipeline_mode<synchronous>, transform_indices = @transform_2, window_bounds = array<i64: 17, 128>}, {transform_indices = @transform_3, window_bounds = array<i64: 1, 17, 128>}]} {
    %c0 = arith.constant 0 : index
    %c0_0 = arith.constant 0 : index
    %0 = vector.load %arg1[%c0, %c0_0] : memref<16x128xbf16, #tpu.memory_space<vmem>>, vector<16x128xbf16>
    %c0_1 = arith.constant 0 : index
    %c0_2 = arith.constant 0 : index
    %1 = vector.load %arg2[%c0_1, %c0_2] : memref<128x128xbf16, #tpu.memory_space<vmem>>, vector<128x128xbf16>
    %cst = arith.constant dense<0.000000e+00> : vector<16x128xf32>
    %2 = tpu.matmul %0, %1, %cst {dimension_numbers = #tpu.dot_dimension_numbers<[1], [0], [0], [1], [0, 0, 1, 1], [], []>} : vector<16x128xbf16>, vector<128x128xbf16>, vector<16x128xf32> -> vector<16x128xf32>
    %c0_3 = arith.constant 0 : index
    %c0_4 = arith.constant 0 : index
    %3 = vector.load %arg3[%c0_3, %c0_4] : memref<17x128xf32, #tpu.memory_space<vmem>>, vector<17x128xf32>
    %4 = vector.shape_cast %2 : vector<16x128xf32> to vector<1x16x128xf32>
    %5 = vector.extract_strided_slice %3 {offsets = [0, 0], sizes = [16, 128], strides = [1, 1]} : vector<17x128xf32> to vector<16x128xf32>
    %6 = vector.shape_cast %5 : vector<16x128xf32> to vector<1x16x128xf32>
    %7 = arith.addf %4, %6 : vector<1x16x128xf32>
    %8 = arith.truncf %7 : vector<1x16x128xf32> to vector<1x16x128xbf16>
    %c0_5 = arith.constant 0 : index
    %c0_6 = arith.constant 0 : index
    %c0_7 = arith.constant 0 : index
    %9 = vector.load %arg4[%c0_5, %c0_6, %c0_7] : memref<1x17x128xbf16, #tpu.memory_space<vmem>>, vector<1x16x128xbf16>
    tpu.vector_store %arg4[%c0_5, %c0_6, %c0_7], %8 {strides = array<i32>} : memref<1x17x128xbf16, #tpu.memory_space<vmem>>, vector<1x16x128xbf16>,
    %10 = vector.extract_strided_slice %3 {offsets = [16, 0], sizes = [1, 128], strides = [1, 1]} : vector<17x128xf32> to vector<1x128xf32>
    %11 = vector.shape_cast %10 : vector<1x128xf32> to vector<1x1x128xf32>
    %12 = arith.truncf %11 : vector<1x1x128xf32> to vector<1x1x128xbf16>
    %c0_8 = arith.constant 0 : index
    %c16 = arith.constant 16 : index
    %c0_9 = arith.constant 0 : index
    %13 = vector.load %arg4[%c0_8, %c16, %c0_9] : memref<1x17x128xbf16, #tpu.memory_space<vmem>>, vector<1x1x128xbf16>
    tpu.vector_store %arg4[%c0_8, %c16, %c0_9], %12 {strides = array<i32>} : memref<1x17x128xbf16, #tpu.memory_space<vmem>>, vector<1x1x128xbf16>,
    return
  }
  func.func @transform_0(%arg0: i32) -> (i32, i32) {
    %c0_i32 = arith.constant 0 : i32
    %c0_i32_0 = arith.constant 0 : i32
    return %arg0, %c0_i32 : i32, i32
  }
  func.func @transform_1(%arg0: i32) -> (i32, i32) {
    %c0_i32 = arith.constant 0 : i32
    %c0_i32_0 = arith.constant 0 : i32
    %c0_i32_1 = arith.constant 0 : i32
    return %c0_i32, %c0_i32_0 : i32, i32
  }
  func.func @transform_2(%arg0: i32) -> (i32, i32) {
    %c0_i32 = arith.constant 0 : i32
    %c0_i32_0 = arith.constant 0 : i32
    %c0_i32_1 = arith.constant 0 : i32
    return %c0_i32, %c0_i32_0 : i32, i32
  }
  func.func @transform_3(%arg0: i32) -> (i32, i32, i32) {
    %c0_i32 = arith.constant 0 : i32
    %c0_i32_0 = arith.constant 0 : i32
    %c0_i32_1 = arith.constant 0 : i32
    return %arg0, %c0_i32, %c0_i32_0 : i32, i32, i32
  }
}

</mosaic_0001>

<bundles_post_ra>
// kernel: tpu_custom_call.1
= control target key start
LH: loop header
LB: loop body
LE: loop exit
PB: predicated region body
PF: predicated region fallthrough
CT: control target
= control target key end

     0   :  { %8 = vsyncpa [#allocation3], 0  ;;  %s879_s0 = inlined_call_operand.hbm [shape: bf16[32,128], index: 0, kind: input, shape index: {}]   ;;  %s880_s1 = inlined_call_operand.hbm [shape: bf16[128,128], index: 1, kind: input, shape index: {}]   ;;  %s881_s2 = inlined_call_operand.hbm [shape: f32[17,128], index: 2, kind: input, shape index: {}]   ;;  %s882_s3 = inlined_call_operand.vmem [shape: bf16[2,17,128], index: 3, kind: output, shape index: {}]  }
   0x1   :  { %10 = vsyncpa [#allocation3 + $0x1], 0 }
   0x2   :  { %11 = vsyncpa [#allocation5], 0  ;;  %s731_s12 = smov 0   ;;  %s733_s13 = smov 0  }
   0x3   :  { %s735_s14 = smov 0   ;;  %s737_s15 = smov 0  }
   0x4 LB: > { %s750_s16 = sadd.s32 4294967295, %s700_s15   ;;  %p37_p0 = scmp.ne.s32.totalorder %s692_s13, %s688_s12  ;;  %s700_s15 = sphi %s737_s15, %s897_s15   ;;  %s696_s14 = sphi %s735_s14, %s896_s14   ;;  %s692_s13 = sphi %s733_s13, %s895_s13   ;;  %s688_s12 = sphi %s731_s12, %s894_s12  }
   0x5   : > { %p883_p1 = scmp.eq.s32.totalorder %s750_s16, 0  ;;  %p444_p2 = scmp.ge.s32.totalorder %s700_s15, 1 }
   0x6   : > { %p116_p3 = scmp.lt.s32.totalorder %s700_s15, 3  ;;  %s702_s19 = smov [#allocation4]  }
   0x7   : > { %p758_p4 = por %p883_p1, %p37_p0  ;;  %s128_s20 = sshll.u32 %s702_s19, 4  ;;  %s129_s20 = int_to_ptr.vmem [resolvable:$true] %s128_s20 }
   0x8   : > { %p762_p5 = pnand %p444_p2, %p116_p3  ;;  %s703_s22 = smov [#allocation6]  }
   0x9   : > { %s886_s17 = scalar_select %p758_p4, 1, 0 }
   0xa   : > { %s887_s18 = scalar_select %p762_p5, 1, 0 }
   0xb   : > { %p517_p6 = pneg %p762_p5  ;;  %s141_s23 = sshll.u32 %s703_s22, 4  ;;  %s142_s23 = int_to_ptr.vmem [resolvable:$true] %s141_s23 }
   0xc   : > { %s593_s24 = scalar_lea.vmem %s129_s20, 1024  ;;  %p601_p12 = scmp.lt.s32.totalorder %s129_s20, %s129_s20 }
   0xd   : > { %p770_p7 = pnand %p517_p6, %p883_p1  ;;  %p594_p9 = scmp.ne.s32.totalorder %s129_s20, %s593_s24 }
   0xe   : > { %p602_p13 = scmp.lt.s32.totalorder %s593_s24, %s593_s24 }
   0xf   : > { %p584_p8 = pneg %p770_p7 }
  0x10   : > { %p603_p0 = por %p602_p13, %p601_p12 }
  0x11   : > { %p596_p10 = pnand %p594_p9, %p584_p8 }
  0x13   : > { %p597_p11 = pneg %p596_p10 }
  0x15   : > { %p604_p2 = pnand %p603_p0, %p597_p11 }
  0x17   : > { %607 = shalt.err (!%p604_p2)
}
  0x18   : > { %s704_s25 = smov 64   ;;  %s705_s26 = smov 4  }
  0x19   : > { %520 = dma.hbm_to_vmem [thread:$0]  (!%p770_p7), %s880_s1, 1024, %s129_s20, [#allocation5], %s704_s25, %s704_s25, %s705_s26  }
  0x1a   : > { %s619_s29 = scalar_lea.vmem %s142_s23, 384  ;;  %p627_p10 = scmp.lt.s32.totalorder %s142_s23, %s142_s23 }
  0x1b   : > { %p620_p3 = scmp.ne.s32.totalorder %s142_s23, %s619_s29  ;;  %p628_p11 = scmp.lt.s32.totalorder %s619_s29, %s619_s29 }
  0x1d   : > { %p622_p6 = pnand %p620_p3, %p584_p8  ;;  %p629_p12 = por %p628_p11, %p627_p10 }
  0x1f   : > { %p623_p9 = pneg %p622_p6 }
  0x21   : > { %p630_p13 = pnand %p629_p12, %p623_p9 }
  0x23   : > { %633 = shalt.err (!%p630_p13)
}
  0x24   : > { %s706_s30 = smov 128   ;;  %s707_s4 = smov 8  }
  0x25   : > { %523 = dma.hbm_to_vmem [thread:$0]  (!%p770_p7), %s881_s2, 384, %s142_s23, [#allocation5], %s706_s30, %s706_s30, %s707_s4  }
  0x26   : > { %s796_s7 = sadd.s32 1, %s700_s15   ;;  %s24_s9 = sadd.s32 1, %s696_s14 }
  0x27   : > { %s21_s8 = ssub.s32 %s700_s15, %s796_s7  ;;  %p31_p0 = scmp.ne.s32.totalorder %s696_s14, %s692_s13 }
  0x28   : > { %p22_p8 = scmp.eq.s32.totalorder %s21_s8, 0  ;;  %p32_p2 = scmp.eq.s32.totalorder %s700_s15, 0 }
  0x29   : > { %p530_p6 = scmp.lt.s32.totalorder %s700_s15, 2  ;;  %s155_s11 = sand.u32 1, %s696_s14  }
  0x2a   : > { %s805_s10 = scalar_select %p22_p8, %s696_s14, %s24_s9  }
  0x2b   : > { %p33_p3 = por %p32_p2, %p31_p0  ;;  %s469_s12 = sshll.u32 %s700_s15, 7 }
  0x2c   : > { %s448_s19 = sshll.u32 %s155_s11, 3  ;;  %s813_s22 = scalar_lea.hbm %s879_s0, %s469_s12 }
  0x2d   : > { %s159_s23 = scalar_lea.vmem [#allocation2], %s448_s19  ;;  %p815_p7 = pnand %p530_p6, %p33_p3 }
  0x2e   : > { %s166_s24 = sshll.u32 %s159_s23, 4  ;;  %s821_s28 = scalar_lea.sflag [#allocation3], %s155_s11  ;;  %s819_s24 = int_to_ptr.vmem [resolvable:$true] %s166_s24 }
  0x2f   : > { %s634_s15 = scalar_lea.hbm %s813_s22, 128  ;;  %p636_p10 = pneg %p815_p7 }
  0x30   : > { %p635_p9 = scmp.ne.s32.totalorder %s813_s22, %s634_s15  ;;  %s639_s4 = scalar_lea.hbm %s879_s0, 256 }
  0x31   : > { %p640_p13 = scmp.lt.s32.totalorder %s813_s22, %s879_s0  ;;  %p641_p8 = scmp.lt.s32.totalorder %s639_s4, %s634_s15 }
  0x32   : > { %p637_p11 = pnand %p636_p10, %p635_p9 }
  0x33   : > { %p642_p0 = por %p641_p8, %p640_p13 }
  0x34   : > { %p638_p12 = pneg %p637_p11 }
  0x36   : > { %p643_p2 = pnand %p642_p0, %p638_p12 }
  0x38   : > { %646 = shalt.err (!%p643_p2)
}
  0x39   : > { %s647_s8 = scalar_lea.vmem %s819_s24, 128  ;;  %s708_s9 = smov [#allocation2]  }
  0x3a   : > { %p648_p3 = scmp.ne.s32.totalorder %s819_s24, %s647_s8  ;;  %s652_s11 = sshll.u32 %s708_s9, 4  ;;  %s653_s11 = int_to_ptr.vmem [resolvable:$false] %s652_s11 }
  0x3b   : > { %s654_s12 = scalar_lea.vmem %s653_s11, 256  ;;  %p655_p11 = scmp.lt.s32.totalorder %s819_s24, %s653_s11 }
  0x3c   : > { %p650_p6 = pnand %p648_p3, %p636_p10  ;;  %p656_p1 = scmp.lt.s32.totalorder %s654_s12, %s647_s8 }
  0x3e   : > { %p651_p9 = pneg %p650_p6  ;;  %p657_p4 = por %p656_p1, %p655_p11 }
  0x40   : > { %p658_p5 = pnand %p657_p4, %p651_p9 }
  0x42   : > { %661 = shalt.err (!%p658_p5)
}
  0x43   : > { %527 = dma.hbm_to_vmem [thread:$0]  (!%p815_p7), %s813_s22, 128, %s819_s24, %s821_s28, %s704_s25, %s704_s25, %s705_s26  }
  0x44   : > { %p890_p10 = scmp.ne.s32.totalorder %s887_s18, 0 }
  0x45   : > { %s180_s19 = sand.u32 (!%p890_p10), 1, %s692_s13   ;;  %p891_p1 = scmp.ne.s32.totalorder (!%p890_p10), %s886_s17, 0 }
  0x46   : > { %178 = sbr.rel (%p890_p10) target bundleno = 314 (0x13a), region = 32  ;;  %s848_s20 = sshll.u32 (!%p890_p10), %s180_s19, 3 }
  0x47   : > { %s181_s21 = scalar_lea.sflag (!%p890_p10), [#allocation3], %s180_s19  ;;  %s184_s23 = scalar_lea.vmem (!%p890_p10), [#allocation2], %s848_s20 }
  0x4b   : > { %679 = dma.done.wait (%p891_p1), %s181_s21, 128  }
  0x4c   : > { %681 = vsyncadd (%p891_p1), %s181_s21, 4294967168  ;;  %p892_p4 = scmp.eq.s32.totalorder %s750_s16, 0 }
  0x4e   : > { %683 = dma.done.wait (%p892_p4), [#allocation5], 1408   ;;  %p893_p5 = pmov %p892_p4 }
  0x4f   : > { %v709_v0 = vmov 0.0   ;;  %vm710_vm0 = vmmov 0   ;;  %v573_v1 = vld [vmem:[#allocation4 + $0x38] sm:$0xff]   ;;  %v574_v2 = vld [vmem:[#allocation4 + $0x30] sm:$0xff]   ;;  %v575_v3 = vld [vmem:[#allocation4 + $0x28] sm:$0xff]   ;;  %p216_p7 = scmp.lt.s32.totalorder %s750_s16, 1 }
  0x50   : > { %685 = vsyncadd (%p893_p5), [#allocation5], 4294965888  ;;  %486 = vmatprep.subr.bf16.mxu0 %v709_v0  ;;  %502 = vmatprep.mubr.msk.bf16.mxu0 %vm710_vm0, %v709_v0  ;;  %v576_v4 = vld [vmem:[#allocation4 + $0x20] sm:$0xff]   ;;  %v577_v5 = vld [vmem:[#allocation4 + $0x18] sm:$0xff]   ;;  %vm351_vm1 = vcmask 1040384  }
  0x51   : > { %487 = vmatpush3.bf16.msra.mxu0 %v573_v1  ;;  %v578_v6 = vld [vmem:[#allocation4 + $0x10] sm:$0xff]   ;;  %v579_v7 = vld [vmem:[#allocation4 + $0x8] sm:$0xff]   ;;  %v580_v8 = vld [vmem:[#allocation4] sm:$0xff]   ;;  %s899_s16 = smov (!%p216_p7, %s750_s16), 1  ;;  %vm352_vm2 = vsmask.f32 256 }
  0x52   : > { %488 = vmatprep.subr.bf16.mxu0 %v709_v0  ;;  %v581_v9 = vld [vmem:[%s184_s23] sm:$0xff]   ;;  %s506_s17 = smul.u32 12, %s899_s16  ;;  %vm353_vm3 = vmand %vm351_vm1, %vm352_vm2  ;;  %v335_v15 = vld [vmem:[#allocation6] sm:$0xff] }
  0x53   : > { %v337_v10 = vld [vmem:[#allocation6 + $0x10] sm:$0x1]  ;;  %v336_v17 = vld [vmem:[#allocation6 + $0x8] sm:$0xff] }
  0x54   : > { %s220_s26 = scalar_lea.vmem %s882_s3, %s506_s17  ;;  %v350_v11 = vpack.c.bf16 %v337_v10, %v337_v10 }
  0x55   : > { %489 = vmatpush3.bf16.msra.mxu0 %v574_v2  ;;  %v354_v12 = vld [vmem:[%s220_s26 + $0x8] sm:$0x1] }
  0x56   : > { %490 = vmatprep.subr.bf16.mxu0 %v709_v0  ;;  %v355_v13 = vsel %vm353_vm3, %v350_v11, %v354_v12 }
  0x57   : > { %356 = vst [vmem:[%s220_s26 + $0x8] sm:$0x1] %v355_v13 }
  0x59   : > { %491 = vmatpush3.bf16.msra.mxu0 %v575_v3 }
  0x5a   : > { %492 = vmatprep.subr.bf16.mxu0 %v709_v0 }
  0x5d   : > { %493 = vmatpush3.bf16.msra.mxu0 %v576_v4 }
  0x5e   : > { %494 = vmatprep.subr.bf16.mxu0 %v709_v0 }
  0x61   : > { %495 = vmatpush3.bf16.msra.mxu0 %v577_v5 }
  0x62   : > { %496 = vmatprep.subr.bf16.mxu0 %v709_v0 }
  0x65   : > { %497 = vmatpush3.bf16.msra.mxu0 %v578_v6 }
  0x66   : > { %498 = vmatprep.subr.bf16.mxu0 %v709_v0 }
  0x69   : > { %499 = vmatpush3.bf16.msra.mxu0 %v579_v7 }
  0x6a   : > { %500 = vmatprep.subr.bf16.mxu0 %v709_v0 }
  0x6d   : > { %501 = vmatpush3.bf16.msra.mxu0 %v580_v8 }
  0x70   : > { %503 = vmatmul.mubr.bf16.vlgmr.msra.gmra.mxu0 %v581_v9 }
 0x130   : > { %v328_v14 = vpop.f32.mrf.mxu0 }
 0x131   : > { %v338_v19 = vadd.f32 %v335_v15, %v328_v14 }
 0x132   : > { %v504_v16 = vpop.f32.mrf.mxu0 }
 0x134   : > { %v331_v18 = vpop.f32.mrf.mxu0 }
 0x135   : > { %v339_v20 = vadd.f32 %v336_v17, %v331_v18 }
 0x136   : > { %v505_v21 = vpop.f32.mrf.mxu0 }
 0x137   : > { %v475_v22 = vpack.c.bf16 %v339_v20, %v338_v19 }
 0x139   : > { %476 = vst [vmem:[%s220_s26] sm:$0xff] %v475_v22  }
 0x13a PF: > { %p14_p12 = scmp.ge.s32.totalorder %s796_s7, 4   ;;  %s894_s12 = smov %s692_s13 }
 0x13b   : > { %s895_s13 = smov %s696_s14  ;;  %s896_s14 = smov %s805_s10 }
 0x13c   : > { %s897_s15 = smov %s796_s7  ;;  %16 = sbr.rel (!%p14_p12) target bundleno = 4 (0x4), region = 80 }
 0x141   :  { %378 = vsyncpa [#allocation3], 1 }
 0x142   :  { %380 = vsyncpa [#allocation3 + $0x1], 1 }
 0x143   :  { %381 = vsyncpa [#allocation5], 1 }

</bundles_post_ra>
